<compile_context>
chip_gen: v6e
topology: v6e:2x2x1
jax: 0.10.0
libtpu: 0.0.40
codegen_flags: <defaults>
</compile_context>

<pallas_src>
import functools

import jax
import jax.numpy as jnp
import numpy as np
from jax.experimental import pallas as pl
from jax.experimental.pallas import tpu as pltpu


def _ipow(z, d):
    """z**d for a static Python int d >= 1, via a binary-exponentiation multiply chain."""
    assert d >= 1
    result = None
    base = z
    while d > 0:
        if d & 1:
            result = base if result is None else result * base
        d >>= 1
        if d:
            base = base * base
    return result


def _polynet_kernel(xt_ref, w_ref, o_ref, *, min_degree, num_degrees, width_seg):
    """One batch tile.

    xt_ref: (dim_pad, tile_b)              -- x tile, transposed (samples on lanes)
    w_ref : (ndeg*width_seg, dim_pad)      -- per-degree weight slabs, stacked (W.T slices)
    o_ref : (1, tile_b)                    -- per-sample sums, lane-dense
    """
    xt = xt_ref[...]                                               # (dim_pad, tile_b)
    # Single MXU matmul for all degree slabs: (ndeg*width_seg, dim_pad) @ (dim_pad, tile_b).
    z = jnp.dot(w_ref[...], xt, preferred_element_type=jnp.float32)
    acc = None
    for k in range(num_degrees):                                   # static unroll (ndeg small)
        zk = z[k * width_seg:(k + 1) * width_seg, :]               # sublane-aligned static slice
        pk = _ipow(zk, min_degree + k)                             # monomial activation (VPU)
        rk = jnp.sum(pk, axis=0, keepdims=True)                    # XLU sublane reduce -> (1, tile_b)
        acc = rk if acc is None else acc + rk
    o_ref[...] = acc


def _split_weights_by_degree(weight_np, degrees_int, min_degree, max_degree, dim_pad):
    """Fold the per-column degree masks into the weights (host-side, numpy).

    Returns (w_stacked, width_seg): w_stacked has shape (ndeg*width_seg, dim_pad);
    rows [k*width_seg, (k+1)*width_seg) hold (transposed) the columns of `weight`
    whose degree is min_degree + k, zero-padded.  Zero rows give z == 0 and
    0**d == 0 (d >= 1), so padding does not change the final sum over columns.
    """
    dim, width = weight_np.shape
    degrees_int = np.asarray(degrees_int)
    ndeg = max_degree - min_degree + 1
    cols_per_deg = [np.nonzero(degrees_int == d)[0] for d in range(min_degree, max_degree + 1)]
    max_count = max(int(c.size) for c in cols_per_deg)
    width_seg = max(8, ((max_count + 7) // 8) * 8)                 # sublane-aligned segment width

    w_stacked = np.zeros((ndeg * width_seg, dim_pad), np.float32)
    w32 = weight_np.astype(np.float32)
    for k, cols in enumerate(cols_per_deg):
        if cols.size:
            w_stacked[k * width_seg:k * width_seg + cols.size, :dim] = w32[:, cols].T
    return w_stacked, width_seg


@functools.partial(jax.jit, static_argnames=("min_degree", "ndeg", "width_seg", "tile_b"))
def _polynet_padded_call(x, w_stacked, *, min_degree, ndeg, width_seg, tile_b):
    B, dim = x.shape
    dim_pad = w_stacked.shape[1]
    B_pad = ((B + tile_b - 1) // tile_b) * tile_b

    # Layout plumbing: transposed, zero-padded x -> lane-dense per-tile DMAs and a
    # lane-dense kernel output without any in-kernel transpose.
    xt = jnp.zeros((dim_pad, B_pad), jnp.float32).at[:dim, :B].set(x.astype(jnp.float32).T)

    kernel = functools.partial(_polynet_kernel, min_degree=min_degree,
                               num_degrees=ndeg, width_seg=width_seg)

    out = pl.pallas_call(
        kernel,
        out_shape=jax.ShapeDtypeStruct((1, B_pad), jnp.float32),
        grid_spec=pltpu.PrefetchScalarGridSpec(
            num_scalar_prefetch=0,
            grid=(B_pad // tile_b,),
            in_specs=[
                pl.BlockSpec((dim_pad, tile_b), lambda i: (0, i)),           # x tile (transposed)
                pl.BlockSpec((ndeg * width_seg, dim_pad), lambda i: (0, 0)),  # resident weights
            ],
            out_specs=pl.BlockSpec((1, tile_b), lambda i: (0, i)),           # lane-dense row slab
        ),
        compiler_params=pltpu.CompilerParams(
            dimension_semantics=("parallel",),          # batch tiles independent (megacore on v7x)
            vmem_limit_bytes=32 * 1024 * 1024,          # explicit budget, safe on v5e/v6e/v7x
        ),
    )(xt, w_stacked)
    return out[0, :B]


def polynet_forward(x, weight, degrees_int, *, min_degree, max_degree, tile_b=512):
    """x: (B, dim) f32, weight: (dim, width) f32, degrees_int: (width,) ints -> (B,) f32."""
    B, dim = x.shape
    dim_w, width = weight.shape
    assert dim == dim_w
    degrees_int = np.asarray(degrees_int)
    assert degrees_int.shape == (width,)
    # Correctness guard: degrees must be integers in [min_degree, max_degree], >= 1
    # (zero-padding of rows/columns is exact only for d >= 1).
    assert min_degree >= 1
    assert np.all((degrees_int >= min_degree) & (degrees_int <= max_degree))
    assert tile_b % 128 == 0, "tile_b must be a multiple of 128 for a lane-dense output block"

    ndeg = max_degree - min_degree + 1
    dim_pad = max(8, ((dim + 7) // 8) * 8)                         # pad contraction dim to >= 8

    weight_np = np.asarray(jax.device_get(weight), dtype=np.float32)
    w_stacked_np, width_seg = _split_weights_by_degree(
        weight_np, degrees_int, min_degree, max_degree, dim_pad)
    w_stacked = jnp.asarray(w_stacked_np)

    return _polynet_padded_call(x, w_stacked, min_degree=min_degree, ndeg=ndeg,
                                width_seg=width_seg, tile_b=tile_b)


def polynet_reference(x, weight, degrees_int):
    """Pure-JAX reference of PolyNet.forward."""
    z = x.astype(jnp.float32) @ weight.astype(jnp.float32)
    a = z ** jnp.asarray(degrees_int, dtype=z.dtype)[None, :]
    return jnp.sum(a, axis=-1)


if __name__ == "__main__":
    # Module hyperparameters (PolyNet(dim, width, max_degree, min_degree)).
    dim = 4
    width = 128
    max_degree = 4
    min_degree = 2
    B = 1024            # batch; grid = B / tile_b = 2 (even -> both v7x TensorCores busy)
    tile_b = 512

    key = jax.random.PRNGKey(0)
    kx, kw = jax.random.split(key)

    # Deterministic parameter init (stand-in for get_parameters(dim, width)).
    weight = (jax.random.normal(kw, (dim, width), dtype=jnp.float32)
              / jnp.sqrt(jnp.float32(width)))

    # Degree-cycled activation exponents over the width: [2,3,4,2,3,4,...].
    base = np.arange(min_degree, max_degree + 1, dtype=np.int32)
    degrees_int = np.tile(base, width // len(base) + 1)[:width]

    x = jax.random.normal(kx, (B, dim), dtype=jnp.float32)

    y = polynet_forward(x, weight, degrees_int,
                        min_degree=min_degree, max_degree=max_degree, tile_b=tile_b)
    y = jax.block_until_ready(y)

    y_ref = polynet_reference(x, weight, degrees_int)
    np.testing.assert_allclose(np.asarray(y), np.asarray(y_ref), rtol=1e-4, atol=1e-5)

    print("KERNEL_OK")
</pallas_src>

<mosaic_0001>
module attributes {stable_mosaic.version = 11 : i64} {
  func.func @_polynet_kernel(%arg0: i32, %arg1: memref<8x512xf32, #tpu.memory_space<vmem>>, %arg2: memref<144x8xf32, #tpu.memory_space<vmem>>, %arg3: memref<1x512xf32, #tpu.memory_space<vmem>>) attributes {dimension_semantics = [#tpu.dimension_semantics<parallel>], iteration_bounds = array<i64: 2>, scalar_prefetch = 0 : i64, scratch_operands = 0 : i64, tpu.core_type = #tpu.core_type<tc>, window_params = [{transform_indices = @transform_0, window_bounds = array<i64: 8, 512>}, {pipeline_mode = #tpu.pipeline_mode<synchronous>, transform_indices = @transform_1, window_bounds = array<i64: 144, 8>}, {transform_indices = @transform_2, window_bounds = array<i64: 1, 512>}]} {
    %c0 = arith.constant 0 : index
    %c0_0 = arith.constant 0 : index
    %0 = vector.load %arg1[%c0, %c0_0] : memref<8x512xf32, #tpu.memory_space<vmem>>, vector<8x512xf32>
    %c0_1 = arith.constant 0 : index
    %c0_2 = arith.constant 0 : index
    %1 = vector.load %arg2[%c0_1, %c0_2] : memref<144x8xf32, #tpu.memory_space<vmem>>, vector<144x8xf32>
    %cst = arith.constant dense<0.000000e+00> : vector<144x512xf32>
    %2 = tpu.matmul %1, %0, %cst {dimension_numbers = #tpu.dot_dimension_numbers<[1], [0], [0], [1], [0, 0, 1, 1], [], []>} : vector<144x8xf32>, vector<8x512xf32>, vector<144x512xf32> -> vector<144x512xf32>
    %3 = vector.extract_strided_slice %2 {offsets = [0, 0], sizes = [48, 512], strides = [1, 1]} : vector<144x512xf32> to vector<48x512xf32>
    %4 = arith.mulf %3, %3 : vector<48x512xf32>
    %cst_3 = arith.constant dense<0.000000e+00> : vector<512xf32>
    %5 = vector.multi_reduction <add>, %4, %cst_3 [0] : vector<48x512xf32> to vector<512xf32>
    %6 = vector.shape_cast %5 : vector<512xf32> to vector<1x512xf32>
    %7 = vector.extract_strided_slice %2 {offsets = [48, 0], sizes = [48, 512], strides = [1, 1]} : vector<144x512xf32> to vector<48x512xf32>
    %8 = arith.mulf %7, %7 : vector<48x512xf32>
    %9 = arith.mulf %7, %8 : vector<48x512xf32>
    %cst_4 = arith.constant dense<0.000000e+00> : vector<512xf32>
    %10 = vector.multi_reduction <add>, %9, %cst_4 [0] : vector<48x512xf32> to vector<512xf32>
    %11 = vector.shape_cast %10 : vector<512xf32> to vector<1x512xf32>
    %12 = arith.addf %6, %11 : vector<1x512xf32>
    %13 = vector.extract_strided_slice %2 {offsets = [96, 0], sizes = [48, 512], strides = [1, 1]} : vector<144x512xf32> to vector<48x512xf32>
    %14 = arith.mulf %13, %13 : vector<48x512xf32>
    %15 = arith.mulf %14, %14 : vector<48x512xf32>
    %cst_5 = arith.constant dense<0.000000e+00> : vector<512xf32>
    %16 = vector.multi_reduction <add>, %15, %cst_5 [0] : vector<48x512xf32> to vector<512xf32>
    %17 = vector.shape_cast %16 : vector<512xf32> to vector<1x512xf32>
    %18 = arith.addf %12, %17 : vector<1x512xf32>
    %c0_6 = arith.constant 0 : index
    %c0_7 = arith.constant 0 : index
    %19 = vector.load %arg3[%c0_6, %c0_7] : memref<1x512xf32, #tpu.memory_space<vmem>>, vector<1x512xf32>
    tpu.vector_store %arg3[%c0_6, %c0_7], %18 {strides = array<i32>} : memref<1x512xf32, #tpu.memory_space<vmem>>, vector<1x512xf32>,
    return
  }
  func.func @transform_0(%arg0: i32) -> (i32, i32) {
    %c0_i32 = arith.constant 0 : i32
    %c0_i32_0 = arith.constant 0 : i32
    return %c0_i32, %arg0 : i32, i32
  }
  func.func @transform_1(%arg0: i32) -> (i32, i32) {
    %c0_i32 = arith.constant 0 : i32
    %c0_i32_0 = arith.constant 0 : i32
    %c0_i32_1 = arith.constant 0 : i32
    return %c0_i32, %c0_i32_0 : i32, i32
  }
  func.func @transform_2(%arg0: i32) -> (i32, i32) {
    %c0_i32 = arith.constant 0 : i32
    %c0_i32_0 = arith.constant 0 : i32
    return %c0_i32, %arg0 : i32, i32
  }
}

</mosaic_0001>

<bundles_post_ra>
// kernel: _polynet_padded_call.1
= control target key start
LH: loop header
LB: loop body
LE: loop exit
PB: predicated region body
PF: predicated region fallthrough
CT: control target
= control target key end

     0   :  { %7 = vsyncpa [#allocation3], 0  ;;  %s1388_s0 = inlined_call_operand.vmem [shape: f32[8,1024], index: 0, kind: input, shape index: {}]   ;;  %s1389_s1 = inlined_call_operand.vmem [shape: f32[144,8], index: 1, kind: input, shape index: {}]   ;;  %s1390_s2 = inlined_call_operand.hbm [shape: f32[1,1024], index: 2, kind: output, shape index: {}]  }
   0x1   :  { %9 = vsyncpa [#allocation3 + $0x1], 0  ;;  %s1106_s9 = smov 0   ;;  %s1108_s10 = smov 0  }
   0x2   :  { %s1110_s11 = smov 0   ;;  %s1112_s12 = smov 0  }
   0x3 LB: > { %s1127_s13 = sadd.s32 4294967295, %s1086_s12   ;;  %s936_s14 = sadd.s32 4294967294, %s1086_s12   ;;  %s1086_s12 = sphi %s1112_s12, %s1396_s12   ;;  %s1082_s11 = sphi %s1110_s11, %s1395_s11   ;;  %s1078_s10 = sphi %s1108_s10, %s1394_s10   ;;  %s1074_s9 = sphi %s1106_s9, %s1393_s9  }
   0x4   : > { %s1131_s15 = sadd.s32 1, %s1086_s12   ;;  %s69_s16 = sadd.s32 1, %s1082_s11 }
   0x5   : > { %s66_s17 = ssub.s32 %s1086_s12, %s1131_s15  ;;  %p79_p0 = scmp.ne.s32.totalorder %s1082_s11, %s1078_s10 }
   0x6   : > { %p67_p1 = scmp.eq.s32.totalorder %s66_s17, 0  ;;  %p80_p2 = scmp.eq.s32.totalorder %s1127_s13, 1 }
   0x7   : > { %p85_p3 = scmp.ne.s32.totalorder %s1078_s10, %s1074_s9  ;;  %p86_p4 = scmp.eq.s32.totalorder %s936_s14, 1 }
   0x8   : > { %s1142_s18 = scalar_select %p67_p1, %s1082_s11, %s69_s16  }
   0x9   : > { %p1144_p5 = por %p80_p2, %p79_p0  ;;  %p1148_p6 = por %p86_p4, %p85_p3 }
   0xa   : > { %p939_p7 = scmp.ge.s32.totalorder %s1086_s12, 1  ;;  %p116_p8 = scmp.lt.s32.totalorder %s1086_s12, 3 }
   0xc   : > { %p117_p9 = pnand %p939_p7, %p116_p8 }
   0xd   : > { %s941_s21 = sshll.u32 (!%p117_p9), %s1127_s13, 2  ;;  %s135_s24 = sand.u32 (!%p117_p9), 1, %s1078_s10  }
   0xe   : > { %120 = sbr.rel (%p117_p9) target bundleno = 329 (0x149), region = 28  ;;  %p139_p10 = scmp.lt.s32.totalorder (!%p117_p9), %s941_s21, 7 }
   0xf   : > { %s984_s26 = sshll.u32 (!%p117_p9), %s1127_s13, 6  ;;  %s863_s4 = scalar_lea.sflag (!%p117_p9), [#allocation3], %s135_s24 }
  0x10   : > { %s875_s3 = scalar_lea.hbm (!%p117_p9), %s1390_s2, %s984_s26  ;;  %s1090_s6 = smov (!%p117_p9), [#allocation2]  }
  0x11   : > { %s1030_s13 = sshll.u32 (!%p117_p9), %s1090_s6, 4  ;;  %s1031_s13 = int_to_ptr.vmem [resolvable:$false] %s1030_s13 }
  0x12   : > { %s1032_s7 = scalar_lea.vmem (!%p117_p9), %s1031_s13, 128 }
  0x13   : > { %v1088_v0 = vmov 0.0   ;;  %s1398_s21 = smov (!%p139_p10, %s941_s21), 7  ;;  %v149_v1 = vld [vmem:[%s1389_s1] sm:$0xff]  ;;  %vm167_vm0 = vcmask 64512   ;;  %v150_v6 = vld [vmem:[%s1389_s1 + $0x8] sm:$0xff]  ;;  %v151_v7 = vld [vmem:[%s1389_s1 + $0x10] sm:$0xff] }
  0x14   : > { %286 = vmatprep.mubr.f32.mxu0 %v1088_v0  ;;  %459 = vmatprep.mubr.f32.mxu1 %v1088_v0  ;;  %s942_s22 = sshll.u32 %s1398_s21, 3  ;;  %v152_v8 = vld [vmem:[%s1389_s1 + $0x18] sm:$0xff]  ;;  %v153_v9 = vld [vmem:[%s1389_s1 + $0x20] sm:$0xff]  ;;  %v154_v10 = vld [vmem:[%s1389_s1 + $0x28] sm:$0xff] }
  0x15   : > { %s142_s25 = scalar_lea.vmem %s1388_s0, %s942_s22  ;;  %v155_v11 = vld [vmem:[%s1389_s1 + $0x30] sm:$0xff]  ;;  %v156_v12 = vld [vmem:[%s1389_s1 + $0x38] sm:$0xff]  ;;  %v157_v13 = vld [vmem:[%s1389_s1 + $0x40] sm:$0xff] }
  0x16   : > { %v146_v2 = vld [vmem:[%s142_s25 + $0x8] sm:$0xff]  ;;  %v148_v3 = vld [vmem:[%s142_s25 + $0x18] sm:$0xff]  ;;  %v145_v4 = vld [vmem:[%s142_s25] sm:$0xff] }
  0x17   : > { %252 = vmatprep.subr.mxu0 %v146_v2  ;;  %425 = vmatprep.subr.mxu1 %v148_v3  ;;  %v147_v5 = vld [vmem:[%s142_s25 + $0x10] sm:$0xff]  ;;  %v158_v14 = vld [vmem:[%s1389_s1 + $0x48] sm:$0xff]  ;;  %v160_v16 = vld [vmem:[%s1389_s1 + $0x58] sm:$0xff]  ;;  %s940_s25 = sshll.u32 %s135_s24, 2 }
  0x18   : > { %253 = vmatpush1.msra.mxu0 %v145_v4  ;;  %426 = vmatpush1.msra.mxu1 %v147_v5  ;;  %v159_v15 = vld [vmem:[%s1389_s1 + $0x50] sm:$0xff]  ;;  %v161_v17 = vld [vmem:[%s1389_s1 + $0x60] sm:$0xff]  ;;  %v162_v18 = vld [vmem:[%s1389_s1 + $0x68] sm:$0xff]  ;;  %s137_s27 = scalar_lea.vmem [#allocation2], %s940_s25 }
  0x19   : > { %943 = vmatmul.mubr.msk.f32.vlgmr.msra.gmra.mxu0 %vm167_vm0, %v149_v1  ;;  %961 = vmatmul.mubr.msk.f32.vlgmr.msra.gmra.mxu1 %vm167_vm0, %v149_v1  ;;  %v163_v19 = vld [vmem:[%s1389_s1 + $0x70] sm:$0xff]  ;;  %v164_v20 = vld [vmem:[%s1389_s1 + $0x78] sm:$0xff]  ;;  %v165_v21 = vld [vmem:[%s1389_s1 + $0x80] sm:$0xff]  ;;  %s877_s28 = sshll.u32 %s137_s27, 4  ;;  %s878_s28 = int_to_ptr.vmem [resolvable:$true] %s877_s28 }
  0x1a   : > { %292 = vmatprep.mubr.f32.mxu0 %v1088_v0  ;;  %465 = vmatprep.mubr.f32.mxu1 %v1088_v0  ;;  %v166_v22 = vld [vmem:[%s1389_s1 + $0x88] sm:$0xff]  ;;  %s1026_s5 = scalar_lea.vmem %s878_s28, 64  ;;  %p1033_p0 = scmp.lt.s32.totalorder %s878_s28, %s1031_s13 }
  0x1b   : > { %p1027_p11 = scmp.ne.s32.totalorder %s878_s28, %s1026_s5  ;;  %p1034_p1 = scmp.lt.s32.totalorder %s1032_s7, %s1026_s5 }
  0x1d   : > { %944 = vmatmul.mubr.msk.f32.gmra.mxu0 %vm167_vm0, %v150_v6  ;;  %962 = vmatmul.mubr.msk.f32.gmra.mxu1 %vm167_vm0, %v150_v6  ;;  %p1028_p12 = pnand %p1027_p11, %p1144_p5  ;;  %p1035_p2 = por %p1034_p1, %p1033_p0 }
  0x1e   : > { %298 = vmatprep.mubr.f32.mxu0 %v1088_v0  ;;  %471 = vmatprep.mubr.f32.mxu1 %v1088_v0 }
  0x1f   : > { %p1029_p13 = pneg %p1028_p12 }
  0x21   : > { %945 = vmatmul.mubr.msk.f32.gmra.mxu0 %vm167_vm0, %v151_v7  ;;  %963 = vmatmul.mubr.msk.f32.gmra.mxu1 %vm167_vm0, %v151_v7  ;;  %p1036_p3 = pnand %p1035_p2, %p1029_p13 }
  0x22   : > { %304 = vmatprep.mubr.f32.mxu0 %v1088_v0  ;;  %477 = vmatprep.mubr.f32.mxu1 %v1088_v0 }
  0x25   : > { %946 = vmatmul.mubr.msk.f32.gmra.mxu0 %vm167_vm0, %v152_v8  ;;  %964 = vmatmul.mubr.msk.f32.gmra.mxu1 %vm167_vm0, %v152_v8 }
  0x26   : > { %310 = vmatprep.mubr.f32.mxu0 %v1088_v0  ;;  %483 = vmatprep.mubr.f32.mxu1 %v1088_v0 }
  0x29   : > { %947 = vmatmul.mubr.msk.f32.gmra.mxu0 %vm167_vm0, %v153_v9  ;;  %965 = vmatmul.mubr.msk.f32.gmra.mxu1 %vm167_vm0, %v153_v9 }
  0x2a   : > { %316 = vmatprep.mubr.f32.mxu0 %v1088_v0  ;;  %489 = vmatprep.mubr.f32.mxu1 %v1088_v0 }
  0x2d   : > { %948 = vmatmul.mubr.msk.f32.gmra.mxu0 %vm167_vm0, %v154_v10  ;;  %966 = vmatmul.mubr.msk.f32.gmra.mxu1 %vm167_vm0, %v154_v10 }
  0x2e   : > { %322 = vmatprep.mubr.f32.mxu0 %v1088_v0  ;;  %495 = vmatprep.mubr.f32.mxu1 %v1088_v0 }
  0x31   : > { %949 = vmatmul.mubr.msk.f32.gmra.mxu0 %vm167_vm0, %v155_v11  ;;  %967 = vmatmul.mubr.msk.f32.gmra.mxu1 %vm167_vm0, %v155_v11 }
  0x32   : > { %328 = vmatprep.mubr.f32.mxu0 %v1088_v0  ;;  %501 = vmatprep.mubr.f32.mxu1 %v1088_v0 }
  0x35   : > { %950 = vmatmul.mubr.msk.f32.gmra.mxu0 %vm167_vm0, %v156_v12  ;;  %968 = vmatmul.mubr.msk.f32.gmra.mxu1 %vm167_vm0, %v156_v12 }
  0x36   : > { %334 = vmatprep.mubr.f32.mxu0 %v1088_v0  ;;  %507 = vmatprep.mubr.f32.mxu1 %v1088_v0 }
  0x39   : > { %951 = vmatmul.mubr.msk.f32.gmra.mxu0 %vm167_vm0, %v157_v13  ;;  %969 = vmatmul.mubr.msk.f32.gmra.mxu1 %vm167_vm0, %v157_v13 }
  0x3a   : > { %340 = vmatprep.mubr.f32.mxu0 %v1088_v0  ;;  %513 = vmatprep.mubr.f32.mxu1 %v1088_v0 }
  0x3d   : > { %952 = vmatmul.mubr.msk.f32.gmra.mxu0 %vm167_vm0, %v158_v14  ;;  %970 = vmatmul.mubr.msk.f32.gmra.mxu1 %vm167_vm0, %v158_v14 }
  0x3e   : > { %346 = vmatprep.mubr.f32.mxu0 %v1088_v0  ;;  %519 = vmatprep.mubr.f32.mxu1 %v1088_v0 }
  0x41   : > { %953 = vmatmul.mubr.msk.f32.gmra.mxu0 %vm167_vm0, %v159_v15  ;;  %971 = vmatmul.mubr.msk.f32.gmra.mxu1 %vm167_vm0, %v159_v15 }
  0x42   : > { %352 = vmatprep.mubr.f32.mxu0 %v1088_v0  ;;  %525 = vmatprep.mubr.f32.mxu1 %v1088_v0 }
  0x45   : > { %954 = vmatmul.mubr.msk.f32.gmra.mxu0 %vm167_vm0, %v160_v16  ;;  %972 = vmatmul.mubr.msk.f32.gmra.mxu1 %vm167_vm0, %v160_v16 }
  0x46   : > { %358 = vmatprep.mubr.f32.mxu0 %v1088_v0  ;;  %531 = vmatprep.mubr.f32.mxu1 %v1088_v0 }
  0x49   : > { %955 = vmatmul.mubr.msk.f32.gmra.mxu0 %vm167_vm0, %v161_v17  ;;  %973 = vmatmul.mubr.msk.f32.gmra.mxu1 %vm167_vm0, %v161_v17 }
  0x4a   : > { %364 = vmatprep.mubr.f32.mxu0 %v1088_v0  ;;  %537 = vmatprep.mubr.f32.mxu1 %v1088_v0 }
  0x4d   : > { %956 = vmatmul.mubr.msk.f32.gmra.mxu0 %vm167_vm0, %v162_v18  ;;  %974 = vmatmul.mubr.msk.f32.gmra.mxu1 %vm167_vm0, %v162_v18 }
  0x4e   : > { %370 = vmatprep.mubr.f32.mxu0 %v1088_v0  ;;  %543 = vmatprep.mubr.f32.mxu1 %v1088_v0 }
  0x51   : > { %957 = vmatmul.mubr.msk.f32.gmra.mxu0 %vm167_vm0, %v163_v19  ;;  %975 = vmatmul.mubr.msk.f32.gmra.mxu1 %vm167_vm0, %v163_v19 }
  0x52   : > { %376 = vmatprep.mubr.f32.mxu0 %v1088_v0  ;;  %549 = vmatprep.mubr.f32.mxu1 %v1088_v0 }
  0x55   : > { %958 = vmatmul.mubr.msk.f32.gmra.mxu0 %vm167_vm0, %v164_v20  ;;  %976 = vmatmul.mubr.msk.f32.gmra.mxu1 %vm167_vm0, %v164_v20 }
  0x56   : > { %382 = vmatprep.mubr.f32.mxu0 %v1088_v0  ;;  %555 = vmatprep.mubr.f32.mxu1 %v1088_v0 }
  0x59   : > { %959 = vmatmul.mubr.msk.f32.gmra.mxu0 %vm167_vm0, %v165_v21  ;;  %977 = vmatmul.mubr.msk.f32.gmra.mxu1 %vm167_vm0, %v165_v21 }
  0x5a   : > { %388 = vmatprep.mubr.f32.mxu0 %v1088_v0  ;;  %561 = vmatprep.mubr.f32.mxu1 %v1088_v0 }
  0x5d   : > { %960 = vmatmul.mubr.msk.f32.gmra.mxu0 %vm167_vm0, %v166_v22  ;;  %978 = vmatmul.mubr.msk.f32.gmra.mxu1 %vm167_vm0, %v166_v22 }
  0xd9   : > { %v288_v23 = vpop.f32.mrf.mxu0  ;;  %v461_v24 = vpop.f32.mrf.mxu1 }
  0xda   : > { %v568_v43 = vmul.f32 %v288_v23, %v288_v23  ;;  %v570_v44 = vmul.f32 %v461_v24, %v461_v24 }
  0xdb   : > { %v290_v25 = vpop.f32.mrf.mxu0  ;;  %v463_v26 = vpop.f32.mrf.mxu1 }
  0xdc   : > { %v569_v57 = vmul.f32 %v290_v25, %v290_v25  ;;  %v571_v58 = vmul.f32 %v463_v26, %v463_v26 }
  0xdd   : > { %v294_v27 = vpop.f32.mrf.mxu0  ;;  %v467_v28 = vpop.f32.mrf.mxu1 }
  0xde   : > { %v572_v39 = vmul.f32 %v294_v27, %v294_v27  ;;  %v574_v40 = vmul.f32 %v467_v28, %v467_v28 }
  0xdf   : > { %v296_v29 = vpop.f32.mrf.mxu0  ;;  %v469_v30 = vpop.f32.mrf.mxu1 }
  0xe0   : > { %v592_v49 = vadd.f32 %v572_v39, %v568_v43  ;;  %v614_v50 = vadd.f32 %v574_v40, %v570_v44  ;;  %v573_v53 = vmul.f32 %v296_v29, %v296_v29  ;;  %v575_v54 = vmul.f32 %v469_v30, %v469_v30 }
  0xe1   : > { %v300_v31 = vpop.f32.mrf.mxu0  ;;  %v473_v32 = vpop.f32.mrf.mxu1 }
  0xe2   : > { %v576_v47 = vmul.f32 %v300_v31, %v300_v31  ;;  %v578_v48 = vmul.f32 %v473_v32, %v473_v32  ;;  %v603_v5 = vadd.f32 %v573_v53, %v569_v57  ;;  %v625_v6 = vadd.f32 %v575_v54, %v571_v58 }
  0xe3   : > { %v302_v33 = vpop.f32.mrf.mxu0  ;;  %v475_v34 = vpop.f32.mrf.mxu1 }
  0xe4   : > { %v593_v61 = vadd.f32 %v592_v49, %v576_v47  ;;  %v615_v62 = vadd.f32 %v614_v50, %v578_v48  ;;  %v577_v63 = vmul.f32 %v302_v33, %v302_v33  ;;  %v579_v0 = vmul.f32 %v475_v34, %v475_v34 }
  0xe5   : > { %v306_v35 = vpop.f32.mrf.mxu0  ;;  %v479_v36 = vpop.f32.mrf.mxu1  ;;  %v837_v47 = vlaneseq }
  0xe6   : > { %v580_v55 = vmul.f32 %v306_v35, %v306_v35  ;;  %v582_v56 = vmul.f32 %v479_v36, %v479_v36  ;;  %v604_v15 = vadd.f32 %v603_v5, %v577_v63  ;;  %v626_v16 = vadd.f32 %v625_v6, %v579_v0 }
  0xe7   : > { %v308_v37 = vpop.f32.mrf.mxu0  ;;  %v481_v38 = vpop.f32.mrf.mxu1  ;;  %vm859_vm1 = vcmp.lt.s32.totalorder %v837_v47, 512 }
  0xe8   : > { %v594_v7 = vadd.f32 %v593_v61, %v580_v55  ;;  %v616_v8 = vadd.f32 %v615_v62, %v582_v56  ;;  %v581_v9 = vmul.f32 %v308_v37, %v308_v37  ;;  %v583_v10 = vmul.f32 %v481_v38, %v481_v38 }
  0xe9   : > { %v312_v41 = vpop.f32.mrf.mxu0  ;;  %v485_v42 = vpop.f32.mrf.mxu1 }
  0xea   : > { %v584_v1 = vmul.f32 %v312_v41, %v312_v41  ;;  %v586_v2 = vmul.f32 %v485_v42, %v485_v42  ;;  %v605_v23 = vadd.f32 %v604_v15, %v581_v9  ;;  %v627_v24 = vadd.f32 %v626_v16, %v583_v10 }
  0xeb   : > { %v314_v45 = vpop.f32.mrf.mxu0  ;;  %v487_v46 = vpop.f32.mrf.mxu1 }
  0xec   : > { %v595_v17 = vadd.f32 %v594_v7, %v584_v1  ;;  %v617_v18 = vadd.f32 %v616_v8, %v586_v2  ;;  %v585_v19 = vmul.f32 %v314_v45, %v314_v45  ;;  %v587_v20 = vmul.f32 %v487_v46, %v487_v46 }
  0xed   : > { %v318_v51 = vpop.f32.mrf.mxu0  ;;  %v491_v52 = vpop.f32.mrf.mxu1  ;;  %v1089_v45 = vmov 1966171168  }
  0xee   : > { %v588_v11 = vmul.f32 %v318_v51, %v318_v51  ;;  %v590_v12 = vmul.f32 %v491_v52, %v491_v52  ;;  %v606_v31 = vadd.f32 %v605_v23, %v585_v19  ;;  %v628_v32 = vadd.f32 %v627_v24, %v587_v20 }
  0xef   : > { %v320_v59 = vpop.f32.mrf.mxu0  ;;  %v493_v60 = vpop.f32.mrf.mxu1  ;;  %v1290_v46 = vunpack.c.l.s4 %v1089_v45 }
  0xf0   : > { %v1284_v25 = vadd.f32 %v595_v17, %v588_v11  ;;  %v1286_v26 = vadd.f32 %v617_v18, %v590_v12  ;;  %v589_v29 = vmul.f32 %v320_v59, %v320_v59  ;;  %v591_v30 = vmul.f32 %v493_v60, %v493_v60 }
  0xf1   : > { %v324_v3 = vpop.f32.mrf.mxu0  ;;  %v497_v4 = vpop.f32.mrf.mxu1 }
  0xf2   : > { %v636_v37 = vmul.f32 %v324_v3, %v324_v3  ;;  %v638_v38 = vmul.f32 %v497_v4, %v497_v4  ;;  %v597_v41 = vrot.slane %v1284_v25, 4  ;;  %v619_v42 = vrot.slane %v1286_v26, 4 }
  0xf3   : > { %v326_v13 = vpop.f32.mrf.mxu0  ;;  %v499_v14 = vpop.f32.mrf.mxu1  ;;  %v1292_v48 = vadd.f32 %v606_v31, %v589_v29  ;;  %v1294_v49 = vadd.f32 %v628_v32, %v591_v30 }
  0xf4   : > { %v637_v50 = vmul.f32 %v326_v13, %v326_v13  ;;  %v639_v51 = vmul.f32 %v499_v14, %v499_v14  ;;  %v660_v58 = vmul.f32 %v636_v37, %v324_v3  ;;  %v662_v59 = vmul.f32 %v638_v38, %v497_v4 }
  0xf5   : > { %v330_v21 = vpop.f32.mrf.mxu0  ;;  %v503_v22 = vpop.f32.mrf.mxu1 }
  0xf6   : > { %v640_v33 = vmul.f32 %v330_v21, %v330_v21  ;;  %v642_v34 = vmul.f32 %v503_v22, %v503_v22  ;;  %v661_v6 = vmul.f32 %v637_v50, %v326_v13  ;;  %v663_v7 = vmul.f32 %v639_v51, %v499_v14 }
  0xf7   : > { %v332_v27 = vpop.f32.mrf.mxu0  ;;  %v505_v28 = vpop.f32.mrf.mxu1 }
  0xf8   : > { %v641_v39 = vmul.f32 %v332_v27, %v332_v27  ;;  %v643_v40 = vmul.f32 %v505_v28, %v505_v28  ;;  %v664_v52 = vmul.f32 %v640_v33, %v330_v21  ;;  %v666_v53 = vmul.f32 %v642_v34, %v503_v22 }
  0xf9   : > { %v336_v35 = vpop.f32.mrf.mxu0  ;;  %v509_v36 = vpop.f32.mrf.mxu1 }
  0xfa   : > { %v644_v54 = vmul.f32 %v336_v35, %v336_v35  ;;  %v646_v55 = vmul.f32 %v509_v36, %v509_v36  ;;  %v665_v60 = vmul.f32 %v641_v39, %v332_v27  ;;  %v667_v61 = vmul.f32 %v643_v40, %v505_v28 }
  0xfb   : > { %v338_v43 = vpop.f32.mrf.mxu0  ;;  %v511_v44 = vpop.f32.mrf.mxu1  ;;  %v684_v10 = vadd.f32 %v664_v52, %v660_v58  ;;  %v706_v11 = vadd.f32 %v666_v53, %v662_v59 }
  0xfc   : > { %v645_v62 = vmul.f32 %v338_v43, %v338_v43  ;;  %v647_v63 = vmul.f32 %v511_v44, %v511_v44  ;;  %v668_v8 = vmul.f32 %v644_v54, %v336_v35  ;;  %v670_v9 = vmul.f32 %v646_v55, %v509_v36 }
  0xfd   : > { %v342_v56 = vpop.f32.mrf.mxu0  ;;  %v515_v57 = vpop.f32.mrf.mxu1  ;;  %v695_v3 = vadd.f32 %v665_v60, %v661_v6  ;;  %v717_v4 = vadd.f32 %v667_v61, %v663_v7 }
  0xfe   : > { %v648_v0 = vmul.f32 %v342_v56, %v342_v56  ;;  %v650_v1 = vmul.f32 %v515_v57, %v515_v57  ;;  %v669_v20 = vmul.f32 %v645_v62, %v338_v43  ;;  %v671_v21 = vmul.f32 %v647_v63, %v511_v44 }
  0xff   : > { %v344_v2 = vpop.f32.mrf.mxu0  ;;  %v517_v5 = vpop.f32.mrf.mxu1  ;;  %v685_v13 = vadd.f32 %v684_v10, %v668_v8  ;;  %v707_v14 = vadd.f32 %v706_v11, %v670_v9  ;;  %v608_v62 = vrot.slane %v1292_v48, 4  ;;  %v630_v63 = vrot.slane %v1294_v49, 4 }
 0x100   : > { %v649_v12 = vmul.f32 %v344_v2, %v344_v2  ;;  %v651_v15 = vmul.f32 %v517_v5, %v517_v5  ;;  %v672_v18 = vmul.f32 %v648_v0, %v342_v56  ;;  %v674_v19 = vmul.f32 %v650_v1, %v515_v57 }
 0x101   : > { %v348_v16 = vpop.f32.mrf.mxu0  ;;  %v521_v17 = vpop.f32.mrf.mxu1  ;;  %v696_v40 = vadd.f32 %v695_v3, %v669_v20  ;;  %v718_v43 = vadd.f32 %v717_v4, %v671_v21  ;;  %v1301_v10 = vadd.f32 %v597_v41, %v1284_v25  ;;  %v1306_v11 = vadd.f32 %v619_v42, %v1286_v26 }
 0x102   : > { %v652_v22 = vmul.f32 %v348_v16, %v348_v16  ;;  %v654_v23 = vmul.f32 %v521_v17, %v521_v17  ;;  %v673_v30 = vmul.f32 %v649_v12, %v344_v2  ;;  %v675_v31 = vmul.f32 %v651_v15, %v517_v5 }
 0x103   : > { %v350_v24 = vpop.f32.mrf.mxu0  ;;  %v523_v27 = vpop.f32.mrf.mxu1  ;;  %v686_v36 = vadd.f32 %v685_v13, %v672_v18  ;;  %v708_v37 = vadd.f32 %v707_v14, %v674_v19  ;;  %v836_v18 = vunpack.c.0.s8 %v1290_v46  ;;  %v1310_v19 = vshrl.u32 %v837_v47, 7 }
 0x104   : > { %v653_v28 = vmul.f32 %v350_v24, %v350_v24  ;;  %v655_v29 = vmul.f32 %v523_v27, %v523_v27  ;;  %v676_v32 = vmul.f32 %v652_v22, %v348_v16  ;;  %v678_v33 = vmul.f32 %v654_v23, %v521_v17 }
 0x105   : > { %v354_v34 = vpop.f32.mrf.mxu0  ;;  %v527_v35 = vpop.f32.mrf.mxu1  ;;  %v697_v56 = vadd.f32 %v696_v40, %v673_v30  ;;  %v719_v57 = vadd.f32 %v718_v43, %v675_v31  ;;  %v1313_v20 = vadd.f32 %v608_v62, %v1292_v48  ;;  %v1316_v25 = vadd.f32 %v630_v63, %v1294_v49 }
 0x106   : > { %v656_v38 = vmul.f32 %v354_v34, %v354_v34  ;;  %v658_v39 = vmul.f32 %v527_v35, %v527_v35  ;;  %v677_v44 = vmul.f32 %v653_v28, %v350_v24  ;;  %v679_v45 = vmul.f32 %v655_v29, %v523_v27 }
 0x107   : > { %v356_v50 = vpop.f32.mrf.mxu0  ;;  %v529_v51 = vpop.f32.mrf.mxu1  ;;  %v687_v52 = vadd.f32 %v686_v36, %v676_v32  ;;  %v709_v53 = vadd.f32 %v708_v37, %v678_v33  ;;  %v599_v22 = vrot.slane %v1301_v10, 2  ;;  %v621_v23 = vrot.slane %v1306_v11, 2 }
 0x108   : > { %v680_v54 = vmul.f32 %v656_v38, %v354_v34  ;;  %v682_v55 = vmul.f32 %v658_v39, %v527_v35  ;;  %v657_v58 = vmul.f32 %v356_v50, %v356_v50  ;;  %v659_v59 = vmul.f32 %v529_v51, %v529_v51 }
 0x109   : > { %v360_v60 = vpop.f32.mrf.mxu0  ;;  %v533_v61 = vpop.f32.mrf.mxu1  ;;  %v698_v2 = vadd.f32 %v697_v56, %v677_v44  ;;  %v720_v5 = vadd.f32 %v719_v57, %v679_v45  ;;  %v610_v34 = vrot.slane %v1313_v20, 2  ;;  %v632_v35 = vrot.slane %v1316_v25, 2 }
 0x10a   : > { %v688_v0 = vadd.f32 %v687_v52, %v680_v54  ;;  %v710_v1 = vadd.f32 %v709_v53, %v682_v55  ;;  %v681_v6 = vmul.f32 %v657_v58, %v356_v50  ;;  %v683_v7 = vmul.f32 %v659_v59, %v529_v51 }
 0x10b   : > { %v362_v8 = vpop.f32.mrf.mxu0  ;;  %v535_v9 = vpop.f32.mrf.mxu1  ;;  %v732_v13 = vmul.f32 %v360_v60, %v360_v60  ;;  %v734_v14 = vmul.f32 %v533_v61, %v533_v61 }
 0x10c   : > { %v699_v12 = vadd.f32 %v698_v2, %v681_v6  ;;  %v721_v15 = vadd.f32 %v720_v5, %v683_v7  ;;  %v689_v3 = vrot.slane %v688_v0, 4  ;;  %v711_v4 = vrot.slane %v710_v1, 4 }
 0x10d   : > { %v366_v16 = vpop.f32.mrf.mxu0  ;;  %v539_v17 = vpop.f32.mrf.mxu1  ;;  %v733_v32 = vmul.f32 %v362_v8, %v362_v8  ;;  %v735_v33 = vmul.f32 %v535_v9, %v535_v9  ;;  %v756_v50 = vmul.f32 %v732_v13, %v732_v13  ;;  %v758_v51 = vmul.f32 %v734_v14, %v734_v14 }
 0x10e   : > { %v736_v41 = vmul.f32 %v366_v16, %v366_v16  ;;  %v738_v26 = vmul.f32 %v539_v17, %v539_v17  ;;  %v700_v24 = vrot.slane %v699_v12, 4  ;;  %v722_v27 = vrot.slane %v721_v15, 4 }
 0x10f   : > { %v368_v42 = vpop.f32.mrf.mxu0  ;;  %v541_v21 = vpop.f32.mrf.mxu1  ;;  %v1320_v31 = vadd.f32 %v689_v3, %v688_v0  ;;  %v1322_v49 = vadd.f32 %v711_v4, %v710_v1  ;;  %v757_v58 = vmul.f32 %v733_v32, %v733_v32  ;;  %v759_v59 = vmul.f32 %v735_v33, %v735_v33 }
 0x110   : > { %v737_v28 = vmul.f32 %v368_v42, %v368_v42  ;;  %v739_v29 = vmul.f32 %v541_v21, %v541_v21  ;;  %v760_v36 = vmul.f32 %v736_v41, %v736_v41  ;;  %v762_v37 = vmul.f32 %v738_v26, %v738_v26 }
 0x111   : > { %v372_v30 = vpop.f32.mrf.mxu0  ;;  %v545_v48 = vpop.f32.mrf.mxu1  ;;  %v1326_v40 = vadd.f32 %v700_v24, %v699_v12  ;;  %v1328_v43 = vadd.f32 %v722_v27, %v721_v15  ;;  %v691_v56 = vrot.slane %v1320_v31, 2  ;;  %v713_v57 = vrot.slane %v1322_v49, 2 }
 0x112   : > { %v740_v44 = vmul.f32 %v372_v30, %v372_v30  ;;  %v742_v45 = vmul.f32 %v545_v48, %v545_v48  ;;  %v761_v52 = vmul.f32 %v737_v28, %v737_v28  ;;  %v763_v53 = vmul.f32 %v739_v29, %v739_v29 }
 0x113   : > { %v374_v38 = vpop.f32.mrf.mxu0  ;;  %v547_v39 = vpop.f32.mrf.mxu1  ;;  %v702_v2 = vrot.slane %v1326_v40, 2  ;;  %v724_v5 = vrot.slane %v1328_v43, 2  ;;  %v780_v6 = vadd.f32 %v760_v36, %v756_v50  ;;  %v802_v7 = vadd.f32 %v762_v37, %v758_v51 }
 0x114   : > { %v764_v60 = vmul.f32 %v740_v44, %v740_v44  ;;  %v766_v61 = vmul.f32 %v742_v45, %v742_v45  ;;  %v741_v62 = vmul.f32 %v374_v38, %v374_v38  ;;  %v743_v63 = vmul.f32 %v547_v39, %v547_v39 }
 0x115   : > { %v378_v54 = vpop.f32.mrf.mxu0  ;;  %v551_v55 = vpop.f32.mrf.mxu1  ;;  %v791_v8 = vadd.f32 %v761_v52, %v757_v58  ;;  %v813_v9 = vadd.f32 %v763_v53, %v759_v59 }
 0x116   : > { %v765_v12 = vmul.f32 %v741_v62, %v741_v62  ;;  %v767_v15 = vmul.f32 %v743_v63, %v743_v63  ;;  %v744_v3 = vmul.f32 %v378_v54, %v378_v54  ;;  %v746_v4 = vmul.f32 %v551_v55, %v551_v55 }
 0x117   : > { %v380_v0 = vpop.f32.mrf.mxu0  ;;  %v553_v1 = vpop.f32.mrf.mxu1  ;;  %v781_v42 = vadd.f32 %v780_v6, %v764_v60  ;;  %v803_v21 = vadd.f32 %v802_v7, %v766_v61 }
 0x118   : > { %v745_v41 = vmul.f32 %v380_v0, %v380_v0  ;;  %v747_v26 = vmul.f32 %v553_v1, %v553_v1  ;;  %v792_v24 = vadd.f32 %v791_v8, %v765_v12  ;;  %v814_v27 = vadd.f32 %v813_v9, %v767_v15 }
 0x119   : > { %v384_v16 = vpop.f32.mrf.mxu0  ;;  %v557_v17 = vpop.f32.mrf.mxu1  ;;  %v768_v28 = vmul.f32 %v744_v3, %v744_v3  ;;  %v770_v29 = vmul.f32 %v746_v4, %v746_v4  ;;  %v703_v3 = vadd.f32 %v702_v2, %v1326_v40  ;;  %v725_v4 = vadd.f32 %v724_v5, %v1328_v43 }
 0x11a   : > { %v769_v30 = vmul.f32 %v745_v41, %v745_v41  ;;  %v771_v48 = vmul.f32 %v747_v26, %v747_v26  ;;  %v748_v32 = vmul.f32 %v384_v16, %v384_v16  ;;  %v750_v33 = vmul.f32 %v557_v17, %v557_v17 }
 0x11b   : > { %v386_v13 = vpop.f32.mrf.mxu0  ;;  %v559_v14 = vpop.f32.mrf.mxu1  ;;  %v782_v44 = vadd.f32 %v781_v42, %v768_v28  ;;  %v804_v45 = vadd.f32 %v803_v21, %v770_v29  ;;  %v692_v16 = vadd.f32 %v691_v56, %v1320_v31  ;;  %v714_v17 = vadd.f32 %v713_v57, %v1322_v49 }
 0x11c   : > { %v749_v36 = vmul.f32 %v386_v13, %v386_v13  ;;  %v751_v37 = vmul.f32 %v559_v14, %v559_v14  ;;  %v793_v50 = vadd.f32 %v792_v24, %v769_v30  ;;  %v815_v51 = vadd.f32 %v814_v27, %v771_v48 }
 0x11d   : > { %v390_v38 = vpop.f32.mrf.mxu0  ;;  %v563_v39 = vpop.f32.mrf.mxu1  ;;  %v772_v52 = vmul.f32 %v748_v32, %v748_v32  ;;  %v774_v53 = vmul.f32 %v750_v33, %v750_v33  ;;  %v600_v24 = vadd.f32 %v599_v22, %v1301_v10  ;;  %v622_v27 = vadd.f32 %v621_v23, %v1306_v11 }
 0x11e   : > { %v773_v54 = vmul.f32 %v749_v36, %v749_v36  ;;  %v775_v55 = vmul.f32 %v751_v37, %v751_v37  ;;  %v752_v60 = vmul.f32 %v390_v38, %v390_v38  ;;  %v754_v61 = vmul.f32 %v563_v39, %v563_v39 }
 0x11f   : > { %v392_v58 = vpop.f32.mrf.mxu0  ;;  %v565_v59 = vpop.f32.mrf.mxu1  ;;  %v783_v0 = vadd.f32 %v782_v44, %v772_v52  ;;  %v805_v1 = vadd.f32 %v804_v45, %v774_v53  ;;  %v611_v31 = vadd.f32 %v610_v34, %v1313_v20  ;;  %v633_v49 = vadd.f32 %v632_v35, %v1316_v25 }
 0x120   : > { %v753_v62 = vmul.f32 %v392_v58, %v392_v58  ;;  %v755_v63 = vmul.f32 %v565_v59, %v565_v59  ;;  %v794_v6 = vadd.f32 %v793_v50, %v773_v54  ;;  %v816_v7 = vadd.f32 %v815_v51, %v775_v55 }
 0x121   : > { %v776_v8 = vmul.f32 %v752_v60, %v752_v60  ;;  %v778_v9 = vmul.f32 %v754_v61, %v754_v61  ;;  %v693_v2 = vrot.slane %v692_v16, 1  ;;  %v715_v5 = vrot.slane %v714_v17, 1 }
 0x122   : > { %v777_v12 = vmul.f32 %v753_v62, %v753_v62  ;;  %v779_v15 = vmul.f32 %v755_v63, %v755_v63  ;;  %v704_v13 = vrot.slane %v703_v3, 1  ;;  %v726_v10 = vrot.slane %v725_v4, 1 }
 0x123   : > { %v784_v41 = vadd.f32 %v783_v0, %v776_v8  ;;  %v806_v26 = vadd.f32 %v805_v1, %v778_v9  ;;  %v601_v23 = vrot.slane %v600_v24, 1  ;;  %v623_v29 = vrot.slane %v622_v27, 1 }
 0x124   : > { %v795_v42 = vadd.f32 %v794_v6, %v777_v12  ;;  %v817_v21 = vadd.f32 %v816_v7, %v779_v15  ;;  %v612_v30 = vrot.slane %v611_v31, 1  ;;  %v634_v20 = vrot.slane %v633_v49, 1 }
 0x125   : > { %v785_v40 = vrot.slane %v784_v41, 4  ;;  %v807_v43 = vrot.slane %v806_v26, 4  ;;  %v694_v35 = vadd.f32 %v693_v2, %v692_v16  ;;  %v716_v33 = vadd.f32 %v715_v5, %v714_v17 }
 0x126   : > { %v796_v56 = vrot.slane %v795_v42, 4  ;;  %v818_v57 = vrot.slane %v817_v21, 4  ;;  %v705_v36 = vadd.f32 %v704_v13, %v703_v3  ;;  %v727_v37 = vadd.f32 %v726_v10, %v725_v4 }
 0x127   : > { %v786_v22 = vadd.f32 %v785_v40, %v784_v41  ;;  %v808_v14 = vadd.f32 %v807_v43, %v806_v26  ;;  %v602_v50 = vadd.f32 %v601_v23, %v600_v24  ;;  %v624_v51 = vadd.f32 %v623_v29, %v622_v27 }
 0x128   : > { %v797_v28 = vadd.f32 %v796_v56, %v795_v42  ;;  %v819_v11 = vadd.f32 %v818_v57, %v817_v21  ;;  %v613_v52 = vadd.f32 %v612_v30, %v611_v31  ;;  %v635_v53 = vadd.f32 %v634_v20, %v633_v49 }
 0x129   : > { %v787_v34 = vrot.slane %v786_v22, 2  ;;  %v809_v48 = vrot.slane %v808_v14, 2  ;;  %v728_v60 = vadd.f32 %v694_v35, %v602_v50  ;;  %v730_v61 = vadd.f32 %v716_v33, %v624_v51 }
 0x12a   : > { %v798_v32 = vrot.slane %v797_v28, 2  ;;  %v820_v25 = vrot.slane %v819_v11, 2  ;;  %v729_v62 = vadd.f32 %v705_v36, %v613_v52  ;;  %v731_v63 = vadd.f32 %v727_v37, %v635_v53 }
 0x12b   : > { %v788_v38 = vadd.f32 %v787_v34, %v786_v22  ;;  %v810_v39 = vadd.f32 %v809_v48, %v808_v14  ;;  %v839_v8 = vsub.s32 %v836_v18, %v1310_v19 }
 0x12c   : > { %v799_v44 = vadd.f32 %v798_v32, %v797_v28  ;;  %v821_v45 = vadd.f32 %v820_v25, %v819_v11 }
 0x12d   : > { %v789_v54 = vrot.slane %v788_v38, 1  ;;  %v811_v55 = vrot.slane %v810_v39, 1 }
 0x12e   : > { %v800_v58 = vrot.slane %v799_v44, 1  ;;  %v822_v59 = vrot.slane %v821_v45, 1 }
 0x12f   : > { %v790_v0 = vadd.f32 %v789_v54, %v788_v38  ;;  %v812_v1 = vadd.f32 %v811_v55, %v810_v39 }
 0x130   : > { %v801_v6 = vadd.f32 %v800_v58, %v799_v44  ;;  %v823_v7 = vadd.f32 %v822_v59, %v821_v45 }
 0x131   : > { %v824_v9 = vadd.f32 %v790_v0, %v728_v60  ;;  %v826_v12 = vadd.f32 %v812_v1, %v730_v61 }
 0x132   : > { %v825_v15 = vadd.f32 %v801_v6, %v729_v62  ;;  %v827_v16 = vadd.f32 %v823_v7, %v731_v63 }
 0x134   : > { %v832_v17 = vcombine.low %v824_v9, %v825_v15  ;;  %v833_v3 = vcombine.low %v826_v12, %v827_v16 }
 0x136   : > { %v840_v4 = vrot.slane %v832_v17, %v839_v8  ;;  %v847_v41 = vrot.slane %v833_v3, %v839_v8 }
 0x138   : > { %v848_v26 = vcombine.low %v840_v4, %v847_v41 }
 0x13a   : > { %v855_v42 = vrot.slane %v848_v26, %v839_v8 }
 0x13c   : > { %861 = vst.msk [vmem:[%s137_s27] sm:$0xf] %vm859_vm1, %v855_v42 }
 0x13d   : > { %1039 = shalt.err (!%p1036_p3)
}
 0x13e   : > { %s1040_s8 = scalar_lea.hbm %s875_s3, 64  ;;  %s1044_s17 = scalar_lea.hbm %s1390_s2, 128 }
 0x13f   : > { %p1041_p4 = scmp.ne.s32.totalorder %s875_s3, %s1040_s8  ;;  %p1045_p9 = scmp.lt.s32.totalorder %s875_s3, %s1390_s2 }
 0x140   : > { %p1046_p10 = scmp.lt.s32.totalorder %s1044_s17, %s1040_s8 }
 0x141   : > { %p1042_p7 = pnand %p1041_p4, %p1144_p5 }
 0x142   : > { %p1047_p11 = por %p1046_p10, %p1045_p9 }
 0x143   : > { %p1043_p8 = pneg %p1042_p7 }
 0x145   : > { %p1048_p12 = pnand %p1047_p11, %p1043_p8 }
 0x147   : > { %1051 = shalt.err (!%p1048_p12)
}
 0x148   : > { %985 = dma.vmem_to_hbm [thread:$0]  (%p1144_p5), %s878_s28, 64, %s875_s3, %s863_s4  }
 0x149 PF: > { %p991_p13 = scmp.ge.s32.totalorder %s1086_s12, 2  ;;  %s889_s23 = sand.u32 1, %s1074_s9  }
 0x14a   : > { %s890_s24 = scalar_lea.sflag [#allocation3], %s889_s23 }
 0x14b   : > { %p988_p0 = pnand %p991_p13, %p1148_p6 }
 0x14d   : > { %p989_p1 = pneg %p988_p0 }
 0x14f   : > { %1069 = dma.done.wait (%p989_p1), %s890_s24, 64  }
 0x150   : > { %1071 = vsyncadd (%p989_p1), %s890_s24, 4294967232  ;;  %p12_p2 = scmp.ge.s32.totalorder %s1131_s15, 4   ;;  %s1393_s9 = smov %s1078_s10 }
 0x151   : > { %s1394_s10 = smov %s1082_s11  ;;  %s1395_s11 = smov %s1142_s18 }
 0x152   : > { %s1396_s12 = smov %s1131_s15  ;;  %14 = sbr.rel (!%p12_p2) target bundleno = 3 (0x3), region = 63 }
 0x157   :  { %895 = vsyncpa [#allocation3], 1 }
 0x158   :  { %897 = vsyncpa [#allocation3 + $0x1], 1 }

</bundles_post_ra>
